<compile_context>
chip_gen: v6e
topology: v6e:2x2x1
jax: 0.10.0
libtpu: 0.0.40
codegen_flags: <defaults>
</compile_context>

<pallas_src>
import functools

import jax
import jax.numpy as jnp
from jax.experimental import pallas as pl
from jax.experimental.pallas import tpu as pltpu


def _round_up(x, m):
    return (x + m - 1) // m * m


def _cnn_kernel(x_ref, w_ref, b_ref, o_ref, *, valid_len):
    # x_ref: (TB, Lp, KC)  w_ref: (KC, E)  b_ref: (1, E)  o_ref: (TB, E)
    TB, Lp, KC = x_ref.shape
    E = w_ref.shape[1]

    # Single lane-dense MXU matmul (KC and E are 128-multiples, Lp % 8 == 0 so
    # the reshape is a tile-aligned view, not a relayout copy).
    xs = x_ref[...].reshape(TB * Lp, KC)
    acc = jnp.dot(xs, w_ref[...], preferred_element_type=jnp.float32)

    # f32 epilogue: bias add + ReLU.
    acc = jnp.maximum(acc + b_ref[...], 0.0)
    acc = acc.reshape(TB, Lp, E)

    # Padded time positions (>= valid_len) would contribute relu(bias); mask them
    # to 0, which is neutral for a max over ReLU outputs (always >= 0).
    if Lp != valid_len:
        t = jax.lax.broadcasted_iota(jnp.int32, (TB, Lp, E), 1)
        acc = jnp.where(t < valid_len, acc, 0.0)

    o_ref[...] = jnp.max(acc, axis=1).astype(o_ref.dtype)  # max over time


def cnn_forward(x_ncl, weight, bias, *, block_b=128, compute_dtype=None):
    """Forward pass of the char-CNN.

    x_ncl:  (B, eChar, mWord)  -- PyTorch NCL layout.
    weight: (eWord, eChar, k)  -- PyTorch Conv1d weight.
    bias:   (eWord,)           -- PyTorch Conv1d bias.
    Returns (B, eWord).
    """
    B, eChar, mWord = x_ncl.shape
    eWord, _, k = weight.shape
    assert mWord >= k, f"mWord ({mWord}) must be >= kernel size k ({k})"
    L = mWord - k + 1

    cd = x_ncl.dtype if compute_dtype is None else compute_dtype

    # --- im2col in the wrapper (cheap layout plumbing, streamed by XLA) -------
    x_cl = jnp.transpose(x_ncl, (0, 2, 1))                   # (B, mWord, eChar)
    win = jnp.arange(L)[:, None] + jnp.arange(k)[None, :]    # (L, k)
    patches = x_cl[:, win, :].reshape(B, L, k * eChar)       # (B, L, k*eChar)
    w2d = jnp.transpose(weight, (2, 1, 0)).reshape(k * eChar, eWord)

    # --- pad to TPU-friendly shapes -------------------------------------------
    KC, E = k * eChar, eWord
    KCp = _round_up(KC, 128)          # lane-dense contraction
    Ep = _round_up(E, 128)            # lane-dense output (unmasked vst)
    Lp = _round_up(L, 8)              # sublane-aligned time dim
    TB = _round_up(min(block_b, _round_up(B, 8)), 8)
    Bp = _round_up(B, TB)

    patches = jnp.pad(patches, ((0, Bp - B), (0, Lp - L), (0, KCp - KC)))
    w2d = jnp.pad(w2d, ((0, KCp - KC), (0, Ep - E)))
    b2d = jnp.pad(bias.astype(jnp.float32), (0, Ep - E)).reshape(1, Ep)

    kernel = functools.partial(_cnn_kernel, valid_len=L)
    out = pl.pallas_call(
        kernel,
        out_shape=jax.ShapeDtypeStruct((Bp, Ep), x_ncl.dtype),
        grid=(Bp // TB,),
        in_specs=[
            pl.BlockSpec((TB, Lp, KCp), lambda i: (i, 0, 0)),
            pl.BlockSpec((KCp, Ep), lambda i: (0, 0)),
            pl.BlockSpec((1, Ep), lambda i: (0, 0)),
        ],
        out_specs=pl.BlockSpec((TB, Ep), lambda i: (i, 0)),
        compiler_params=pltpu.CompilerParams(
            dimension_semantics=("parallel",)),
    )(patches.astype(cd), w2d.astype(cd), b2d)

    return out[:B, :E]


def _reference(x_ncl, weight, bias):
    # Pure-JAX reference: Conv1d (valid, stride 1) + ReLU + max over time.
    y = jax.lax.conv_general_dilated(
        x_ncl, weight, window_strides=(1,), padding="VALID",
        dimension_numbers=("NCH", "OIH", "NCH"))
    y = y + bias[None, :, None]
    y = jnp.maximum(y, 0.0)
    return jnp.max(y, axis=-1)


if __name__ == "__main__":
    # Small shapes consistent with the module (B = batch x sent_len words).
    B, eChar, mWord, eWord, k = 20, 8, 16, 32, 5

    key = jax.random.PRNGKey(0)
    kx, kw, kb = jax.random.split(key, 3)
    x = jax.random.normal(kx, (B, eChar, mWord), dtype=jnp.float32)
    # Deterministic "Conv1d" parameters (synthetic init, PyTorch shapes).
    weight = jax.random.normal(kw, (eWord, eChar, k), dtype=jnp.float32) * 0.1
    bias = jax.random.normal(kb, (eWord,), dtype=jnp.float32) * 0.1

    ref = _reference(x, weight, bias)

    # f32 path with a small batch tile so the parallel grid has multiple steps
    # (TB=8 -> Bp=24 -> 3 grid steps), exercising pipelining + batch padding.
    out = jax.block_until_ready(cnn_forward(x, weight, bias, block_b=8))
    assert out.shape == (B, eWord)
    assert jnp.allclose(out, ref, atol=1e-5, rtol=1e-5), "f32 mismatch vs reference"

    # bf16-operand path (f32 MXU accumulation + f32 epilogue), looser tolerance.
    out_bf16 = jax.block_until_ready(
        cnn_forward(x, weight, bias, block_b=128, compute_dtype=jnp.bfloat16))
    assert out_bf16.shape == (B, eWord)
    assert jnp.allclose(out_bf16, ref, atol=5e-2, rtol=5e-2), "bf16 mismatch vs reference"

    print("KERNEL_OK")
</pallas_src>

<mosaic_0001>
module attributes {stable_mosaic.version = 11 : i64} {
  func.func @_cnn_kernel(%arg0: i32, %arg1: memref<8x16x128xf32, #tpu.memory_space<vmem>>, %arg2: memref<128x128xf32, #tpu.memory_space<vmem>>, %arg3: memref<1x128xf32, #tpu.memory_space<vmem>>, %arg4: memref<8x128xf32, #tpu.memory_space<vmem>>) attributes {dimension_semantics = [#tpu.dimension_semantics<parallel>], iteration_bounds = array<i64: 3>, scalar_prefetch = 0 : i64, scratch_operands = 0 : i64, tpu.core_type = #tpu.core_type<tc>, window_params = [{transform_indices = @transform_0, window_bounds = array<i64: 8, 16, 128>}, {pipeline_mode = #tpu.pipeline_mode<synchronous>, transform_indices = @transform_1, window_bounds = array<i64: 128, 128>}, {pipeline_mode = #tpu.pipeline_mode<synchronous>, transform_indices = @transform_2, window_bounds = array<i64: 1, 128>}, {transform_indices = @transform_3, window_bounds = array<i64: 8, 128>}]} {
    %c0 = arith.constant 0 : index
    %c0_0 = arith.constant 0 : index
    %c0_1 = arith.constant 0 : index
    %0 = vector.load %arg1[%c0, %c0_0, %c0_1] : memref<8x16x128xf32, #tpu.memory_space<vmem>>, vector<8x16x128xf32>
    %1 = vector.shape_cast %0 : vector<8x16x128xf32> to vector<128x128xf32>
    %c0_2 = arith.constant 0 : index
    %c0_3 = arith.constant 0 : index
    %2 = vector.load %arg2[%c0_2, %c0_3] : memref<128x128xf32, #tpu.memory_space<vmem>>, vector<128x128xf32>
    %cst = arith.constant dense<0.000000e+00> : vector<128x128xf32>
    %3 = tpu.matmul %1, %2, %cst {dimension_numbers = #tpu.dot_dimension_numbers<[1], [0], [0], [1], [0, 0, 1, 1], [], []>} : vector<128x128xf32>, vector<128x128xf32>, vector<128x128xf32> -> vector<128x128xf32>
    %c0_4 = arith.constant 0 : index
    %c0_5 = arith.constant 0 : index
    %4 = vector.load %arg3[%c0_4, %c0_5] : memref<1x128xf32, #tpu.memory_space<vmem>>, vector<1x128xf32>
    %5 = vector.broadcast %4 : vector<1x128xf32> to vector<128x128xf32>
    %6 = arith.addf %3, %5 : vector<128x128xf32>
    %cst_6 = arith.constant 0.000000e+00 : f32
    %7 = vector.broadcast %cst_6 : f32 to vector<128x128xf32>
    %8 = arith.maximumf %6, %7 : vector<128x128xf32>
    %9 = vector.shape_cast %8 : vector<128x128xf32> to vector<8x16x128xf32>
    %10 = tpu.iota {dimensions = array<i32: 1>} : vector<8x16x128xi32>
    %c12_i32 = arith.constant 12 : i32
    %11 = vector.broadcast %c12_i32 : i32 to vector<8x16x128xi32>
    %12 = arith.cmpi slt, %10, %11 : vector<8x16x128xi32>
    %cst_7 = arith.constant 0.000000e+00 : f32
    %13 = vector.broadcast %cst_7 : f32 to vector<8x16x128xf32>
    %14 = arith.select %12, %9, %13 : vector<8x16x128xi1>, vector<8x16x128xf32>
    %cst_8 = arith.constant dense<0xFF800000> : vector<8x128xf32>
    %15 = vector.multi_reduction <maximumf>, %14, %cst_8 [1] : vector<8x16x128xf32> to vector<8x128xf32>
    %c0_9 = arith.constant 0 : index
    %c0_10 = arith.constant 0 : index
    %16 = vector.load %arg4[%c0_9, %c0_10] : memref<8x128xf32, #tpu.memory_space<vmem>>, vector<8x128xf32>
    tpu.vector_store %arg4[%c0_9, %c0_10], %15 {strides = array<i32>} : memref<8x128xf32, #tpu.memory_space<vmem>>, vector<8x128xf32>,
    return
  }
  func.func @transform_0(%arg0: i32) -> (i32, i32, i32) {
    %c0_i32 = arith.constant 0 : i32
    %c0_i32_0 = arith.constant 0 : i32
    %c0_i32_1 = arith.constant 0 : i32
    return %arg0, %c0_i32, %c0_i32_0 : i32, i32, i32
  }
  func.func @transform_1(%arg0: i32) -> (i32, i32) {
    %c0_i32 = arith.constant 0 : i32
    %c0_i32_0 = arith.constant 0 : i32
    %c0_i32_1 = arith.constant 0 : i32
    return %c0_i32, %c0_i32_0 : i32, i32
  }
  func.func @transform_2(%arg0: i32) -> (i32, i32) {
    %c0_i32 = arith.constant 0 : i32
    %c0_i32_0 = arith.constant 0 : i32
    %c0_i32_1 = arith.constant 0 : i32
    return %c0_i32, %c0_i32_0 : i32, i32
  }
  func.func @transform_3(%arg0: i32) -> (i32, i32) {
    %c0_i32 = arith.constant 0 : i32
    %c0_i32_0 = arith.constant 0 : i32
    return %arg0, %c0_i32 : i32, i32
  }
}

</mosaic_0001>

<bundles_post_ra>
// kernel: tpu_custom_call.1
= control target key start
LH: loop header
LB: loop body
LE: loop exit
PB: predicated region body
PF: predicated region fallthrough
CT: control target
= control target key end

     0   :  { %8 = vsyncpa [#allocation3], 0  ;;  %s1180_s0 = inlined_call_operand.hbm [shape: f32[24,16,128], index: 0, kind: input, shape index: {}]   ;;  %s1181_s1 = inlined_call_operand.hbm [shape: f32[128,128], index: 1, kind: input, shape index: {}]   ;;  %s1182_s2 = inlined_call_operand.vmem [shape: f32[1,128], index: 2, kind: input, shape index: {}]   ;;  %s1183_s3 = inlined_call_operand.hbm [shape: f32[24,128], index: 3, kind: output, shape index: {}]  }
   0x1   :  { %10 = vsyncpa [#allocation3 + $0x1], 0 }
   0x2   :  { %11 = vsyncpa [#allocation6], 0 }
   0x3   :  { %12 = vsyncpa [#allocation4], 0 }
   0x4   :  { %14 = vsyncpa [#allocation4 + $0x1], 0  ;;  %s948_s12 = smov 0   ;;  %s950_s13 = smov 0  }
   0x5   :  { %s952_s14 = smov 0   ;;  %s954_s15 = smov 0  }
   0x6 LB: > { %s969_s16 = sadd.s32 4294967295, %s921_s15   ;;  %s601_s17 = sadd.s32 4294967294, %s921_s15   ;;  %s921_s15 = sphi %s954_s15, %s1204_s15   ;;  %s917_s14 = sphi %s952_s14, %s1203_s14   ;;  %s913_s13 = sphi %s950_s13, %s1202_s13   ;;  %s909_s12 = sphi %s948_s12, %s1201_s12  }
   0x7   : > { %p40_p0 = scmp.ne.s32.totalorder %s913_s13, %s909_s12  ;;  %p1184_p1 = scmp.eq.s32.totalorder %s969_s16, 0 }
   0x8   : > { %p112_p3 = scmp.eq.s32.totalorder %s601_s17, 2  ;;  %p602_p5 = scmp.ge.s32.totalorder %s921_s15, 1 }
   0x9   : > { %p978_p4 = por %p1184_p1, %p40_p0  ;;  %p119_p7 = scmp.lt.s32.totalorder %s921_s15, 4 }
   0xa   : > { %p983_p6 = por %p112_p3, %p40_p0  ;;  %s923_s21 = smov [#allocation5]  }
   0xb   : > { %s1188_s18 = scalar_select %p978_p4, 1, 0 }
   0xc   : > { %s1189_s19 = scalar_select %p983_p6, 1, 0 }
   0xd   : > { %p988_p8 = pnand %p602_p5, %p119_p7  ;;  %s131_s22 = sshll.u32 %s923_s21, 4  ;;  %s132_s22 = int_to_ptr.vmem [resolvable:$true] %s131_s22 }
   0xe   : > { %s1001_s24 = sadd.s32 1, %s921_s15   ;;  %s27_s25 = sadd.s32 1, %s917_s14 }
   0xf   : > { %s1190_s20 = scalar_select %p988_p8, 1, 0 }
  0x10   : > { %p748_p9 = pneg %p988_p8  ;;  %s24_s26 = ssub.s32 %s921_s15, %s1001_s24 }
  0x11   : > { %s810_s27 = scalar_lea.vmem %s132_s22, 2048  ;;  %p818_p3 = scmp.lt.s32.totalorder %s132_s22, %s132_s22 }
  0x12   : > { %p996_p10 = pnand %p748_p9, %p1184_p1  ;;  %p811_p12 = scmp.ne.s32.totalorder %s132_s22, %s810_s27 }
  0x13   : > { %p819_p5 = scmp.lt.s32.totalorder %s810_s27, %s810_s27 }
  0x14   : > { %p801_p11 = pneg %p996_p10 }
  0x15   : > { %p820_p7 = por %p819_p5, %p818_p3 }
  0x16   : > { %p813_p13 = pnand %p811_p12, %p801_p11 }
  0x18   : > { %p814_p0 = pneg %p813_p13 }
  0x1a   : > { %p821_p2 = pnand %p820_p7, %p814_p0 }
  0x1c   : > { %824 = shalt.err (!%p821_p2)
}
  0x1d   : > { %s924_s28 = smov 128   ;;  %s925_s29 = smov 8  }
  0x1e   : > { %751 = dma.hbm_to_vmem [thread:$0]  (!%p996_p10), %s1181_s1, 2048, %s132_s22, [#allocation6], %s924_s28, %s924_s28, %s925_s29  }
  0x1f   : > { %p25_p2 = scmp.eq.s32.totalorder %s24_s26, 0  ;;  %p34_p9 = scmp.ne.s32.totalorder %s917_s14, %s913_s13 }
  0x20   : > { %p35_p11 = scmp.eq.s32.totalorder %s921_s15, 0  ;;  %p761_p12 = scmp.lt.s32.totalorder %s921_s15, 3 }
  0x21   : > { %s1021_s5 = scalar_select %p25_p2, %s917_s14, %s27_s25  }
  0x22   : > { %p36_p13 = por %p35_p11, %p34_p9  ;;  %p1192_p0 = scmp.eq.s32.totalorder %s969_s16, 2 }
  0x23   : > { %s148_s7 = sand.u32 1, %s917_s14   ;;  %s619_s8 = sshll.u32 %s921_s15, 11 }
  0x24   : > { %p1025_p3 = por %p1192_p0, %p34_p9  ;;  %s605_s9 = sshll.u32 %s148_s7, 7 }
  0x25   : > { %s1034_s17 = scalar_lea.hbm %s1180_s0, %s619_s8  ;;  %s152_s21 = scalar_lea.vmem [#allocation2], %s605_s9 }
  0x26   : > { %s1193_s6 = scalar_select %p1025_p3, 1, 0 }
  0x27   : > { %s160_s22 = sshll.u32 %s152_s21, 4  ;;  %p1036_p10 = pnand %p761_p12, %p36_p13  ;;  %s1040_s22 = int_to_ptr.vmem [resolvable:$true] %s160_s22 }
  0x28   : > { %s1042_s25 = scalar_lea.sflag [#allocation3], %s148_s7  ;;  %s825_s26 = scalar_lea.hbm %s1034_s17, 2048 }
  0x29   : > { %p826_p5 = scmp.ne.s32.totalorder %s1034_s17, %s825_s26  ;;  %p827_p7 = pneg %p1036_p10 }
  0x2a   : > { %s830_s4 = scalar_lea.hbm %s1180_s0, 6144  ;;  %p831_p11 = scmp.lt.s32.totalorder %s1034_s17, %s1180_s0 }
  0x2b   : > { %p828_p2 = pnand %p827_p7, %p826_p5  ;;  %p832_p12 = scmp.lt.s32.totalorder %s830_s4, %s825_s26 }
  0x2d   : > { %p829_p9 = pneg %p828_p2  ;;  %p833_p13 = por %p832_p12, %p831_p11 }
  0x2f   : > { %p834_p0 = pnand %p833_p13, %p829_p9 }
  0x31   : > { %837 = shalt.err (!%p834_p0)
}
  0x32   : > { %s838_s7 = scalar_lea.vmem %s1040_s22, 2048  ;;  %s926_s10 = smov [#allocation2]  }
  0x33   : > { %p839_p1 = scmp.ne.s32.totalorder %s1040_s22, %s838_s7  ;;  %s843_s11 = sshll.u32 %s926_s10, 4  ;;  %s844_s11 = int_to_ptr.vmem [resolvable:$false] %s843_s11 }
  0x34   : > { %s845_s21 = scalar_lea.vmem %s844_s11, 4096  ;;  %p846_p2 = scmp.lt.s32.totalorder %s1040_s22, %s844_s11 }
  0x35   : > { %p841_p6 = pnand %p839_p1, %p827_p7  ;;  %p847_p3 = scmp.lt.s32.totalorder %s845_s21, %s838_s7 }
  0x37   : > { %p842_p5 = pneg %p841_p6  ;;  %p848_p4 = por %p847_p3, %p846_p2 }
  0x39   : > { %p849_p8 = pnand %p848_p4, %p842_p5 }
  0x3b   : > { %852 = shalt.err (!%p849_p8)
}
  0x3c   : > { %755 = dma.hbm_to_vmem [thread:$0]  (!%p1036_p10), %s1034_s17, 2048, %s1040_s22, %s1042_s25, %s924_s28, %s924_s28, %s925_s29  }
  0x3d   : > { %p1195_p1 = scmp.ne.s32.totalorder %s1190_s20, 0 }
  0x3e   : > { %s1069_s26 = sand.u32 (!%p1195_p1), 1, %s913_s13   ;;  %p1196_p4 = scmp.ne.s32.totalorder (!%p1195_p1), %s1188_s18, 0 }
  0x3f   : > { %172 = sbr.rel (%p1195_p1) target bundleno = 349 (0x15d), region = 32  ;;  %s610_s27 = sshll.u32 (!%p1195_p1), %s1069_s26, 7 }
  0x40   : > { %s175_s30 = scalar_lea.sflag (!%p1195_p1), [#allocation3], %s1069_s26  ;;  %s1073_s4 = scalar_lea.vmem (!%p1195_p1), [#allocation2], %s610_s27 }
  0x44   : > { %896 = dma.done.wait (%p1196_p4), %s175_s30, 2048  }
  0x45   : > { %898 = vsyncadd (%p1196_p4), %s175_s30, 4294965248  ;;  %p1197_p6 = scmp.eq.s32.totalorder %s969_s16, 0 }
  0x47   : > { %900 = dma.done.wait (%p1197_p6), [#allocation6], 2048   ;;  %p1198_p8 = pmov %p1197_p6 }
  0x48   : > { %v237_v0 = vld [vmem:[#allocation5 + $0x78] sm:$0xff]  ;;  %v236_v1 = vld [vmem:[#allocation5 + $0x70] sm:$0xff]  ;;  %v235_v2 = vld [vmem:[#allocation5 + $0x68] sm:$0xff]  ;;  %v406_v32 = vlaneseq  ;;  %s612_s28 = sshll.u32 %s1069_s26, 3  ;;  %vm491_vm1 = vcmask 1041409   ;;  %vm493_vm2 = vcmask 1042434  }
  0x49   : > { %902 = vsyncadd (%p1198_p8), [#allocation6], 4294965248  ;;  %652 = vmatprep.subr.mxu0 %v237_v0  ;;  %708 = vmatprep.subr.mxu1 %v237_v0  ;;  %v234_v3 = vld [vmem:[#allocation5 + $0x60] sm:$0xff]  ;;  %v233_v4 = vld [vmem:[#allocation5 + $0x58] sm:$0xff]  ;;  %vm495_vm3 = vcmask 1043459   ;;  %vm497_vm4 = vcmask 1044484  }
  0x4a   : > { %653 = vmatpush3.msra.mxu0 %v237_v0  ;;  %724 = vmatpush3.msra.mxu1 %v237_v0  ;;  %v232_v5 = vld [vmem:[#allocation5 + $0x50] sm:$0xff]  ;;  %v231_v6 = vld [vmem:[#allocation5 + $0x48] sm:$0xff]  ;;  %v230_v7 = vld [vmem:[#allocation5 + $0x40] sm:$0xff]  ;;  %v407_v33 = vshrl.u32 %v406_v32, 7  ;;  %vm499_vm5 = vcmask 1045509   ;;  %vm501_vm6 = vcmask 1046534  }
  0x4b   : > { %654 = vmatprep.subr.mxu0 %v236_v1  ;;  %709 = vmatprep.subr.mxu1 %v236_v1  ;;  %v229_v8 = vld [vmem:[#allocation5 + $0x38] sm:$0xff]  ;;  %v228_v9 = vld [vmem:[#allocation5 + $0x30] sm:$0xff]  ;;  %v227_v10 = vld [vmem:[#allocation5 + $0x28] sm:$0xff]  ;;  %s615_s29 = sshll.u32 %s969_s16, 7  ;;  %s204_s17 = scalar_lea.vmem [#allocation7], %s612_s28  ;;  %vm503_vm7 = vcmask 1047559  }
  0x4c   : > { %655 = vmatpush3.msra.mxu0 %v236_v1  ;;  %725 = vmatpush3.msra.mxu1 %v236_v1  ;;  %v226_v11 = vld [vmem:[#allocation5 + $0x20] sm:$0xff]  ;;  %v225_v12 = vld [vmem:[#allocation5 + $0x18] sm:$0xff]  ;;  %v224_v13 = vld [vmem:[#allocation5 + $0x10] sm:$0xff]  ;;  %v1105_v38 = vadd.s32 8, %v407_v33  ;;  %s521_s22 = sshll.u32 %s204_s17, 4  ;;  %s1144_s8 = scalar_lea.hbm %s1183_s3, %s615_s29  ;;  %s522_s22 = int_to_ptr.vmem [resolvable:$true] %s521_s22 }
  0x4d   : > { %656 = vmatprep.subr.mxu0 %v235_v2  ;;  %710 = vmatprep.subr.mxu1 %v235_v2  ;;  %v223_v14 = vld [vmem:[#allocation5 + $0x8] sm:$0xff]  ;;  %v222_v15 = vld [vmem:[#allocation5] sm:$0xff]  ;;  %v208_v20 = vld [vmem:[%s1073_s4 + $0x10] sm:$0xff]  ;;  %s508_s9 = scalar_lea.sflag [#allocation4], %s1069_s26  ;;  %s853_s7 = scalar_lea.vmem %s522_s22, 128 }
  0x4e   : > { %657 = vmatpush3.msra.mxu0 %v235_v2  ;;  %726 = vmatpush3.msra.mxu1 %v235_v2  ;;  %v206_v16 = vld [vmem:[%s1073_s4] sm:$0xff]  ;;  %v207_v18 = vld [vmem:[%s1073_s4 + $0x8] sm:$0xff]  ;;  %v216_v21 = vld [vmem:[%s1073_s4 + $0x50] sm:$0xff]  ;;  %vm410_vm0 = vcmp.lt.s32.totalorder %v1105_v38, 12  ;;  %p854_p3 = scmp.ne.s32.totalorder %s522_s22, %s853_s7  ;;  %p1199_p10 = scmp.ne.s32.totalorder %s1193_s6, 0 }
  0x4f   : > { %658 = vmatprep.subr.mxu0 %v234_v3  ;;  %711 = vmatprep.subr.mxu1 %v234_v3  ;;  %v214_v17 = vld [vmem:[%s1073_s4 + $0x40] sm:$0xff]  ;;  %v215_v19 = vld [vmem:[%s1073_s4 + $0x48] sm:$0xff]  ;;  %v209_v22 = vld [vmem:[%s1073_s4 + $0x18] sm:$0xff]  ;;  %s927_s16 = smov [#allocation7]  }
  0x50   : > { %659 = vmatpush3.msra.mxu0 %v234_v3  ;;  %727 = vmatpush3.msra.mxu1 %v234_v3  ;;  %v217_v23 = vld [vmem:[%s1073_s4 + $0x58] sm:$0xff]  ;;  %v210_v24 = vld [vmem:[%s1073_s4 + $0x20] sm:$0xff]  ;;  %v211_v26 = vld [vmem:[%s1073_s4 + $0x28] sm:$0xff]  ;;  %p855_p7 = pnand %p854_p3, %p1199_p10  ;;  %s857_s10 = sshll.u32 %s927_s16, 4  ;;  %s858_s10 = int_to_ptr.vmem [resolvable:$false] %s857_s10 }
  0x51   : > { %660 = vmatprep.subr.mxu0 %v233_v4  ;;  %712 = vmatprep.subr.mxu1 %v233_v4  ;;  %v218_v25 = vld [vmem:[%s1073_s4 + $0x60] sm:$0xff]  ;;  %v219_v27 = vld [vmem:[%s1073_s4 + $0x68] sm:$0xff]  ;;  %v212_v28 = vld [vmem:[%s1073_s4 + $0x30] sm:$0xff]  ;;  %s859_s11 = scalar_lea.vmem %s858_s10, 256  ;;  %p860_p11 = scmp.lt.s32.totalorder %s522_s22, %s858_s10 }
  0x52   : > { %661 = vmatpush3.msra.mxu0 %v233_v4  ;;  %728 = vmatpush3.msra.mxu1 %v233_v4  ;;  %v220_v29 = vld [vmem:[%s1073_s4 + $0x70] sm:$0xff]  ;;  %v213_v30 = vld [vmem:[%s1073_s4 + $0x38] sm:$0xff]  ;;  %v1102_v34 = vld [vmem:[%s1182_s2] ss:$0 sm:$0xff]  ;;  %p856_p9 = pneg %p855_p7  ;;  %p861_p12 = scmp.lt.s32.totalorder %s859_s11, %s853_s7 }
  0x53   : > { %662 = vmatprep.subr.mxu0 %v232_v5  ;;  %713 = vmatprep.subr.mxu1 %v232_v5  ;;  %v221_v31 = vld [vmem:[%s1073_s4 + $0x78] sm:$0xff] }
  0x54   : > { %663 = vmatpush3.msra.mxu0 %v232_v5  ;;  %729 = vmatpush3.msra.mxu1 %v232_v5  ;;  %p862_p13 = por %p861_p12, %p860_p11 }
  0x55   : > { %664 = vmatprep.subr.mxu0 %v231_v6  ;;  %714 = vmatprep.subr.mxu1 %v231_v6 }
  0x56   : > { %665 = vmatpush3.msra.mxu0 %v231_v6  ;;  %730 = vmatpush3.msra.mxu1 %v231_v6  ;;  %p863_p0 = pnand %p862_p13, %p856_p9 }
  0x57   : > { %666 = vmatprep.subr.mxu0 %v230_v7  ;;  %715 = vmatprep.subr.mxu1 %v230_v7 }
  0x58   : > { %667 = vmatpush3.msra.mxu0 %v230_v7  ;;  %731 = vmatpush3.msra.mxu1 %v230_v7 }
  0x59   : > { %668 = vmatprep.subr.mxu0 %v229_v8  ;;  %716 = vmatprep.subr.mxu1 %v229_v8 }
  0x5a   : > { %669 = vmatpush3.msra.mxu0 %v229_v8  ;;  %732 = vmatpush3.msra.mxu1 %v229_v8 }
  0x5b   : > { %670 = vmatprep.subr.mxu0 %v228_v9  ;;  %717 = vmatprep.subr.mxu1 %v228_v9 }
  0x5c   : > { %671 = vmatpush3.msra.mxu0 %v228_v9  ;;  %733 = vmatpush3.msra.mxu1 %v228_v9 }
  0x5d   : > { %672 = vmatprep.subr.mxu0 %v227_v10  ;;  %718 = vmatprep.subr.mxu1 %v227_v10 }
  0x5e   : > { %673 = vmatpush3.msra.mxu0 %v227_v10  ;;  %734 = vmatpush3.msra.mxu1 %v227_v10 }
  0x5f   : > { %674 = vmatprep.subr.mxu0 %v226_v11  ;;  %719 = vmatprep.subr.mxu1 %v226_v11 }
  0x60   : > { %675 = vmatpush3.msra.mxu0 %v226_v11  ;;  %735 = vmatpush3.msra.mxu1 %v226_v11 }
  0x61   : > { %676 = vmatprep.subr.mxu0 %v225_v12  ;;  %720 = vmatprep.subr.mxu1 %v225_v12 }
  0x62   : > { %677 = vmatpush3.msra.mxu0 %v225_v12  ;;  %736 = vmatpush3.msra.mxu1 %v225_v12 }
  0x63   : > { %678 = vmatprep.subr.mxu0 %v224_v13  ;;  %721 = vmatprep.subr.mxu1 %v224_v13 }
  0x64   : > { %679 = vmatpush3.msra.mxu0 %v224_v13  ;;  %737 = vmatpush3.msra.mxu1 %v224_v13 }
  0x65   : > { %680 = vmatprep.subr.mxu0 %v223_v14  ;;  %722 = vmatprep.subr.mxu1 %v223_v14 }
  0x66   : > { %681 = vmatpush3.msra.mxu0 %v223_v14  ;;  %738 = vmatpush3.msra.mxu1 %v223_v14 }
  0x67   : > { %682 = vmatprep.subr.mxu0 %v222_v15  ;;  %723 = vmatprep.subr.mxu1 %v222_v15 }
  0x68   : > { %683 = vmatpush3.msra.mxu0 %v222_v15  ;;  %739 = vmatpush3.msra.mxu1 %v222_v15 }
  0x69   : > { %684 = vmatprep.mubr.f32.mxu0 %v206_v16  ;;  %696 = vmatprep.mubr.f32.mxu1 %v214_v17 }
  0x6a   : > { %685 = vmatmul.mubr.f32.vlgmr.msra.gmra.mxu0 %v207_v18  ;;  %697 = vmatmul.mubr.f32.vlgmr.msra.gmra.mxu1 %v215_v19 }
  0x6b   : > { %687 = vmatprep.mubr.f32.mxu0 %v208_v20  ;;  %699 = vmatprep.mubr.f32.mxu1 %v216_v21 }
  0x6e   : > { %688 = vmatmul.mubr.f32.gmra.mxu0 %v209_v22  ;;  %700 = vmatmul.mubr.f32.gmra.mxu1 %v217_v23 }
  0x6f   : > { %690 = vmatprep.mubr.f32.mxu0 %v210_v24  ;;  %702 = vmatprep.mubr.f32.mxu1 %v218_v25 }
  0x72   : > { %691 = vmatmul.mubr.f32.gmra.mxu0 %v211_v26  ;;  %703 = vmatmul.mubr.f32.gmra.mxu1 %v219_v27 }
  0x73   : > { %693 = vmatprep.mubr.f32.mxu0 %v212_v28  ;;  %705 = vmatprep.mubr.f32.mxu1 %v220_v29 }
  0x76   : > { %694 = vmatmul.mubr.f32.gmra.mxu0 %v213_v30  ;;  %706 = vmatmul.mubr.f32.gmra.mxu1 %v221_v31 }
 0x12a   : > { %v686_v35 = vpop.f32.mrf.mxu0  ;;  %v698_v36 = vpop.f32.mrf.mxu1 }
 0x12b   : > { %v317_v37 = vadd.f32 %v686_v35, %v1102_v34  ;;  %v357_v39 = vadd.f32 %v698_v36, %v1102_v34 }
 0x12c   : > { %v311_v40 = vpop.f32.mrf.mxu0  ;;  %v351_v41 = vpop.f32.mrf.mxu1 }
 0x12d   : > { %v312_v42 = vadd.f32 %v1102_v34, %v311_v40  ;;  %v391_v43 = vmax.f32 %v317_v37, 0.0  ;;  %v352_v46 = vadd.f32 %v1102_v34, %v351_v41  ;;  %v399_v47 = vmax.f32 %v357_v39, 0.0 }
 0x12e   : > { %v689_v44 = vpop.f32.mrf.mxu0  ;;  %v701_v45 = vpop.f32.mrf.mxu1 }
 0x12f   : > { %v327_v48 = vadd.f32 %v689_v44, %v1102_v34  ;;  %v367_v49 = vadd.f32 %v701_v45, %v1102_v34  ;;  %v390_v52 = vmax.f32 %v312_v42, 0.0  ;;  %v412_v55 = vsel %vm410_vm0, %v391_v43, 0.0 }
 0x130   : > { %v321_v50 = vpop.f32.mrf.mxu0  ;;  %v361_v51 = vpop.f32.mrf.mxu1  ;;  %v398_v60 = vmax.f32 %v352_v46, 0.0  ;;  %v420_v62 = vsel %vm410_vm0, %v399_v47, 0.0 }
 0x131   : > { %v322_v53 = vadd.f32 %v1102_v34, %v321_v50  ;;  %v362_v54 = vadd.f32 %v1102_v34, %v361_v51  ;;  %v393_v56 = vmax.f32 %v327_v48, 0.0  ;;  %v401_v57 = vmax.f32 %v367_v49, 0.0 }
 0x132   : > { %v692_v58 = vpop.f32.mrf.mxu0  ;;  %v704_v59 = vpop.f32.mrf.mxu1  ;;  %v427_v4 = vmax.f32 %v390_v52, %v412_v55  ;;  %v455_v12 = vmax.f32 %v398_v60, %v420_v62 }
 0x133   : > { %v392_v61 = vmax.f32 %v322_v53, 0.0  ;;  %v414_v63 = vsel %vm410_vm0, %v393_v56, 0.0  ;;  %v337_v0 = vadd.f32 %v692_v58, %v1102_v34  ;;  %v377_v1 = vadd.f32 %v704_v59, %v1102_v34 }
 0x134   : > { %v331_v2 = vpop.f32.mrf.mxu0  ;;  %v371_v3 = vpop.f32.mrf.mxu1  ;;  %v422_v5 = vsel %vm410_vm0, %v401_v57, 0.0  ;;  %v400_v7 = vmax.f32 %v362_v54, 0.0  ;;  %v428_v20 = vrot.slane %v427_v4, 4  ;;  %v456_v27 = vrot.slane %v455_v12, 4 }
 0x135   : > { %v434_v6 = vmax.f32 %v392_v61, %v414_v63  ;;  %v395_v8 = vmax.f32 %v337_v0, 0.0  ;;  %v403_v9 = vmax.f32 %v377_v1, 0.0  ;;  %v332_v10 = vadd.f32 %v1102_v34, %v331_v2 }
 0x136   : > { %v372_v11 = vadd.f32 %v1102_v34, %v371_v3  ;;  %v695_v14 = vpop.f32.mrf.mxu0  ;;  %v707_v15 = vpop.f32.mrf.mxu1  ;;  %v462_v21 = vmax.f32 %v400_v7, %v422_v5  ;;  %v429_v33 = vmax.f32 %v427_v4, %v428_v20  ;;  %v457_v42 = vmax.f32 %v455_v12, %v456_v27 }
 0x137   : > { %v435_v13 = vrot.slane %v434_v6, 4  ;;  %v416_v16 = vsel %vm410_vm0, %v395_v8, 0.0  ;;  %v424_v17 = vsel %vm410_vm0, %v403_v9, 0.0  ;;  %v394_v18 = vmax.f32 %v332_v10, 0.0 }
 0x138   : > { %v402_v19 = vmax.f32 %v372_v11, 0.0  ;;  %v347_v24 = vadd.f32 %v695_v14, %v1102_v34  ;;  %v387_v25 = vadd.f32 %v707_v15, %v1102_v34  ;;  %v341_v31 = vpop.f32.mrf.mxu0  ;;  %v381_v32 = vpop.f32.mrf.mxu1  ;;  %v463_v35 = vrot.slane %v462_v21, 4 }
 0x139   : > { %v441_v22 = vmax.f32 %v394_v18, %v416_v16  ;;  %v436_v26 = vmax.f32 %v434_v6, %v435_v13  ;;  %v342_v40 = vadd.f32 %v1102_v34, %v341_v31  ;;  %v382_v41 = vadd.f32 %v1102_v34, %v381_v32 }
 0x13a   : > { %v469_v23 = vmax.f32 %v402_v19, %v424_v17  ;;  %v397_v29 = vmax.f32 %v347_v24, 0.0  ;;  %v405_v30 = vmax.f32 %v387_v25, 0.0  ;;  %v430_v46 = vrot.slane %v429_v33, 2 }
 0x13b   : > { %v442_v28 = vrot.slane %v441_v22, 4  ;;  %v437_v39 = vrot.slane %v436_v26, 2  ;;  %v464_v47 = vmax.f32 %v462_v21, %v463_v35  ;;  %v396_v48 = vmax.f32 %v342_v40, 0.0 }
 0x13c   : > { %v470_v37 = vrot.slane %v469_v23, 4  ;;  %v418_v44 = vsel %vm410_vm0, %v397_v29, 0.0  ;;  %v426_v45 = vsel %vm410_vm0, %v405_v30, 0.0  ;;  %v404_v49 = vmax.f32 %v382_v41, 0.0 }
 0x13d   : > { %v443_v36 = vmax.f32 %v441_v22, %v442_v28  ;;  %v438_v51 = vmax.f32 %v436_v26, %v437_v39  ;;  %v448_v52 = vmax.f32 %v396_v48, %v418_v44  ;;  %v458_v54 = vrot.slane %v457_v42, 2 }
 0x13e   : > { %v471_v50 = vmax.f32 %v469_v23, %v470_v37  ;;  %v476_v53 = vmax.f32 %v404_v49, %v426_v45  ;;  %v431_v56 = vmax.f32 %v429_v33, %v430_v46  ;;  %v465_v34 = vrot.slane %v464_v47, 2 }
 0x13f   : > { %v444_v43 = vrot.slane %v443_v36, 2  ;;  %v449_v57 = vrot.slane %v448_v52, 4  ;;  %v439_v60 = vrot.slane %v438_v51, 1  ;;  %v459_v62 = vmax.f32 %v457_v42, %v458_v54 }
 0x140   : > { %v477_v58 = vrot.slane %v476_v53, 4  ;;  %v472_v59 = vrot.slane %v471_v50, 2  ;;  %v432_v0 = vrot.slane %v431_v56, 1  ;;  %v466_v1 = vmax.f32 %v464_v47, %v465_v34 }
 0x141   : > { %v445_v55 = vmax.f32 %v443_v36, %v444_v43  ;;  %v450_v61 = vmax.f32 %v448_v52, %v449_v57  ;;  %v440_v5 = vmax.f32 %v438_v51, %v439_v60  ;;  %v460_v8 = vrot.slane %v459_v62, 1 }
 0x142   : > { %v478_v38 = vmax.f32 %v476_v53, %v477_v58  ;;  %v473_v4 = vmax.f32 %v471_v50, %v472_v59  ;;  %v433_v10 = vmax.f32 %v431_v56, %v432_v0  ;;  %v467_v11 = vrot.slane %v466_v1, 1 }
 0x143   : > { %v446_v63 = vrot.slane %v445_v55, 1  ;;  %v451_v2 = vrot.slane %v450_v61, 2  ;;  %v461_v17 = vmax.f32 %v459_v62, %v460_v8 }
 0x144   : > { %v479_v3 = vrot.slane %v478_v38, 2  ;;  %v474_v13 = vrot.slane %v473_v4, 1  ;;  %v492_v14 = vsel %vm491_vm1, %v440_v5, %v433_v10  ;;  %v468_v19 = vmax.f32 %v466_v1, %v467_v11 }
 0x145   : > { %v452_v6 = vmax.f32 %v450_v61, %v451_v2  ;;  %v447_v9 = vmax.f32 %v445_v55, %v446_v63 }
 0x146   : > { %v480_v7 = vmax.f32 %v478_v38, %v479_v3  ;;  %v475_v21 = vmax.f32 %v473_v4, %v474_v13 }
 0x147   : > { %v453_v12 = vrot.slane %v452_v6, 1  ;;  %v494_v18 = vsel %vm493_vm2, %v447_v9, %v492_v14 }
 0x148   : > { %v481_v16 = vrot.slane %v480_v7, 1 }
 0x149   : > { %v454_v15 = vmax.f32 %v452_v6, %v453_v12 }
 0x14a   : > { %v482_v23 = vmax.f32 %v480_v7, %v481_v16 }
 0x14b   : > { %v496_v20 = vsel %vm495_vm3, %v454_v15, %v494_v18 }
 0x14c   : > { %v498_v22 = vsel %vm497_vm4, %v461_v17, %v496_v20 }
 0x14d   : > { %v500_v24 = vsel %vm499_vm5, %v468_v19, %v498_v22 }
 0x14e   : > { %v502_v25 = vsel %vm501_vm6, %v475_v21, %v500_v24 }
 0x14f   : > { %v504_v26 = vsel %vm503_vm7, %v482_v23, %v502_v25 }
 0x150   : > { %506 = vst [vmem:[%s204_s17] sm:$0xff] %v504_v26 }
 0x151   : > { %866 = shalt.err (!%p863_p0)
}
 0x152   : > { %s867_s21 = scalar_lea.hbm %s1144_s8, 128  ;;  %s871_s30 = scalar_lea.hbm %s1183_s3, 384 }
 0x153   : > { %p868_p5 = scmp.ne.s32.totalorder %s1144_s8, %s867_s21  ;;  %p872_p4 = scmp.lt.s32.totalorder %s1144_s8, %s1183_s3 }
 0x154   : > { %p873_p6 = scmp.lt.s32.totalorder %s871_s30, %s867_s21 }
 0x155   : > { %p869_p2 = pnand %p868_p5, %p1199_p10 }
 0x156   : > { %p874_p8 = por %p873_p6, %p872_p4 }
 0x157   : > { %p870_p1 = pneg %p869_p2 }
 0x159   : > { %p875_p3 = pnand %p874_p8, %p870_p1 }
 0x15b   : > { %878 = shalt.err (!%p875_p3)
}
 0x15c   : > { %746 = dma.vmem_to_hbm [thread:$0]  (%p1199_p10), %s522_s22, 128, %s1144_s8, %s508_s9  }
 0x15d PF: > { %p763_p7 = scmp.ge.s32.totalorder %s921_s15, 2  ;;  %s533_s20 = sand.u32 1, %s909_s12  }
 0x15e   : > { %p1200_p9 = scmp.ne.s32.totalorder %s1189_s19, 0  ;;  %s534_s28 = scalar_lea.sflag [#allocation4], %s533_s20 }
 0x160   : > { %p757_p11 = pnand %p763_p7, %p1200_p9 }
 0x162   : > { %p758_p12 = pneg %p757_p11 }
 0x164   : > { %904 = dma.done.wait (%p758_p12), %s534_s28, 128  }
 0x165   : > { %906 = vsyncadd (%p758_p12), %s534_s28, 4294967168  ;;  %p17_p13 = scmp.ge.s32.totalorder %s1001_s24, 5   ;;  %s1201_s12 = smov %s913_s13 }
 0x166   : > { %s1202_s13 = smov %s917_s14  ;;  %s1203_s14 = smov %s1021_s5 }
 0x167   : > { %s1204_s15 = smov %s1001_s24  ;;  %19 = sbr.rel (!%p17_p13) target bundleno = 6 (0x6), region = 81 }
 0x16c   :  { %539 = vsyncpa [#allocation3], 1 }
 0x16d   :  { %541 = vsyncpa [#allocation3 + $0x1], 1 }
 0x16e   :  { %542 = vsyncpa [#allocation6], 1 }
 0x16f   :  { %543 = vsyncpa [#allocation4], 1 }
 0x170   :  { %545 = vsyncpa [#allocation4 + $0x1], 1 }

</bundles_post_ra>
